<compile_context>
chip_gen: v7x
topology: tpu7x:2x2x1
jax: 0.10.0
libtpu: 0.0.40
codegen_flags: <defaults>
</compile_context>

<pallas_src>
import functools

import jax
import jax.numpy as jnp
from jax.experimental import pallas as pl
from jax.experimental.pallas import tpu as pltpu


def _round_up(n, m):
    return ((n + m - 1) // m) * m


def _sequential_kernel(x_ref, w1_ref, w2_ref, b1_ref, b2_ref, o_ref):
    # ---- child 1: Linear(D_in -> D_hid) ----
    # x arrives in its original dtype; cast to the bf16 MXU input dtype here
    # (saves a full wrapper-side HBM pass), accumulate in f32 on the MXU.
    x = x_ref[...].astype(w1_ref.dtype)
    h = jnp.dot(x, w1_ref[...], preferred_element_type=jnp.float32)
    # ---- bias add + child 2: ReLU (kept on the f32 accumulator; v5e-safe) ----
    h = jnp.maximum(h + b1_ref[...], 0.0)
    # ---- child 3: Linear(D_hid -> D_out) ----
    y = jnp.dot(h.astype(w2_ref.dtype), w2_ref[...],
                preferred_element_type=jnp.float32)
    o_ref[...] = (y + b2_ref[...]).astype(o_ref.dtype)


def _default_tile_b():
    # DMA-bound kernel: the tile must be big enough to amortize the ~0.35us
    # per-grid-step cost.  v7x (~3.2 TB/s HBM) needs an even larger tile.
    try:
        kind = jax.devices()[0].device_kind.lower()
    except Exception:  # pragma: no cover - defensive, CPU/interpret fallback
        kind = ""
    return 8192 if "v7" in kind else 2048


@functools.partial(jax.jit, static_argnames=("tile_b", "compute_dtype"))
def sequential_forward(x, w1, b1, w2, b2, *, tile_b=None,
                       compute_dtype=jnp.bfloat16):
    """Fused Sequential(Linear, ReLU, Linear) forward.

    x : (B, D_in)        w1: (D_in, D_hid)   b1: (1, D_hid)
    w2: (D_hid, D_out)   b2: (1, D_out)      ->  (B, D_out)  (x.dtype)
    """
    B, D_in = x.shape
    D_hid = w1.shape[1]
    D_out = w2.shape[1]
    out_dtype = x.dtype

    if tile_b is None:
        tile_b = _default_tile_b()

    # Hidden width padded to lane-dense 128 (exact: padded bias cols are 0,
    # ReLU keeps them 0, and w2's padded rows are 0).  Output keeps its
    # natural width D_out as a full-extent last dim (no 8x padded writeback).
    P_hid = _round_up(D_hid, 128)

    # Batch tiling: multiples of 8 (sublanes).  For large batches cap the tile
    # at ~half the batch so there are >=2 grid tiles and the "parallel" axis
    # can shard across v7x's two TensorCores (no-op on 1-TC v5e/v6e).
    B8 = _round_up(B, 8)
    tile_b = max(8, _round_up(min(tile_b, B8), 8))
    if B8 >= 2048:
        half = _round_up(pl.cdiv(B8, 2), 8)
        tile_b = min(tile_b, half)
    n_tiles = pl.cdiv(B8, tile_b)
    B_p = n_tiles * tile_b

    # ---- wrapper-side packing: weights/biases only (tiny); x stays raw and
    # is only row-padded when B isn't a whole number of tiles.  Under jit
    # these fuse with neighbors instead of being separate HBM passes. ----
    w1_p = jnp.zeros((D_in, P_hid), compute_dtype).at[:, :D_hid].set(
        w1.astype(compute_dtype))
    w2_p = jnp.zeros((P_hid, D_out), compute_dtype).at[:D_hid, :].set(
        w2.astype(compute_dtype))
    b1_p = jnp.zeros((1, P_hid), jnp.float32).at[0, :D_hid].set(
        b1.reshape(-1).astype(jnp.float32))
    b2_p = b2.reshape(1, D_out).astype(jnp.float32)

    if B_p != B:
        x_in = jnp.zeros((B_p, D_in), x.dtype).at[:B].set(x)
    else:
        x_in = x

    out_shape = jax.ShapeDtypeStruct((B_p, D_out), out_dtype)
    vmem_limit = 32 * 1024 * 1024  # safe on all generations (v7x: 64 MiB phys)

    if n_tiles == 1:
        # Single tile: no grid at all -> no per-step bookkeeping, everything
        # VMEM resident via one-shot DMAs.
        out_p = pl.pallas_call(
            _sequential_kernel,
            out_shape=out_shape,
            in_specs=[pl.BlockSpec(memory_space=pltpu.MemorySpace.VMEM)] * 5,
            out_specs=pl.BlockSpec(memory_space=pltpu.MemorySpace.VMEM),
            compiler_params=pltpu.CompilerParams(vmem_limit_bytes=vmem_limit),
        )(x_in, w1_p, w2_p, b1_p, b2_p)
    else:
        out_p = pl.pallas_call(
            _sequential_kernel,
            out_shape=out_shape,
            grid_spec=pltpu.PrefetchScalarGridSpec(
                num_scalar_prefetch=0,
                grid=(n_tiles,),
                in_specs=[
                    # x: full-extent last dim (D_in), raw dtype, no lane pad.
                    pl.BlockSpec((tile_b, D_in), lambda i: (i, 0)),
                    # Weights / biases: constant block index -> VMEM-resident
                    # across batch tiles (DMA'd once, never re-fetched).
                    pl.BlockSpec((D_in, P_hid), lambda i: (0, 0)),
                    pl.BlockSpec((P_hid, D_out), lambda i: (0, 0)),
                    pl.BlockSpec((1, P_hid), lambda i: (0, 0)),
                    pl.BlockSpec((1, D_out), lambda i: (0, 0)),
                ],
                # Output: full-extent last dim (D_out) -> f32 writeback is the
                # true payload size, not a 128-lane padded slab.
                out_specs=pl.BlockSpec((tile_b, D_out), lambda i: (i, 0)),
            ),
            compiler_params=pltpu.CompilerParams(
                dimension_semantics=("parallel",),
                vmem_limit_bytes=vmem_limit),
        )(x_in, w1_p, w2_p, b1_p, b2_p)

    # Padded batch rows hold 0*W2 + b2 (not zeros) -> must be sliced off.
    return out_p[:B] if B_p != B else out_p


def _reference(x, w1, b1, w2, b2, compute_dtype=jnp.bfloat16):
    # Same precision policy as the kernel (bf16 matmul inputs, f32 accumulate).
    h = jnp.dot(x.astype(compute_dtype), w1.astype(compute_dtype),
                preferred_element_type=jnp.float32) + b1
    h = jnp.maximum(h, 0.0)
    y = jnp.dot(h.astype(compute_dtype), w2.astype(compute_dtype),
                preferred_element_type=jnp.float32) + b2
    return y.astype(x.dtype)


if __name__ == "__main__":
    key = jax.random.PRNGKey(0)
    k_x, k_w1, k_b1, k_w2, k_b2, k_x2 = jax.random.split(key, 6)

    B, D_in, D_hid, D_out = 8, 32, 64, 16

    x = jax.random.normal(k_x, (B, D_in), dtype=jnp.float32)
    # Deterministic "parameter init" (synthetic, kaiming-ish scale).
    w1 = jax.random.normal(k_w1, (D_in, D_hid), dtype=jnp.float32) * (1.0 / D_in ** 0.5)
    b1 = jax.random.normal(k_b1, (1, D_hid), dtype=jnp.float32) * 0.01
    w2 = jax.random.normal(k_w2, (D_hid, D_out), dtype=jnp.float32) * (1.0 / D_hid ** 0.5)
    b2 = jax.random.normal(k_b2, (1, D_out), dtype=jnp.float32) * 0.01

    # Small batch -> grid-less path.
    out = jax.block_until_ready(sequential_forward(x, w1, b1, w2, b2))
    ref = _reference(x, w1, b1, w2, b2)
    assert out.shape == (B, D_out)
    assert jnp.allclose(out, ref, atol=2e-3, rtol=2e-3), "mismatch (small batch)"

    # Larger batch with a forced small tile -> batch-tiled 'parallel' grid path
    # with a ragged tail (exercises the row padding + slice logic).
    B2 = 600
    x2 = jax.random.normal(k_x2, (B2, D_in), dtype=jnp.float32)
    out2 = jax.block_until_ready(
        sequential_forward(x2, w1, b1, w2, b2, tile_b=256))
    ref2 = _reference(x2, w1, b1, w2, b2)
    assert out2.shape == (B2, D_out)
    assert jnp.allclose(out2, ref2, atol=2e-3, rtol=2e-3), "mismatch (tiled batch)"

    print("KERNEL_OK")
</pallas_src>

<mosaic_0001>
module attributes {stable_mosaic.version = 11 : i64} {
  func.func @_sequential_kernel(%arg0: memref<8x32xf32, #tpu.memory_space<vmem>>, %arg1: memref<32x128xbf16, #tpu.memory_space<vmem>>, %arg2: memref<128x16xbf16, #tpu.memory_space<vmem>>, %arg3: memref<1x128xf32, #tpu.memory_space<vmem>>, %arg4: memref<1x16xf32, #tpu.memory_space<vmem>>, %arg5: memref<8x16xf32, #tpu.memory_space<vmem>>) attributes {dimension_semantics = [], scalar_prefetch = 0 : i64, scratch_operands = 0 : i64, tpu.core_type = #tpu.core_type<tc>} {
    %c0 = arith.constant 0 : index
    %c0_0 = arith.constant 0 : index
    %0 = vector.load %arg0[%c0, %c0_0] : memref<8x32xf32, #tpu.memory_space<vmem>>, vector<8x32xf32>
    %1 = arith.truncf %0 : vector<8x32xf32> to vector<8x32xbf16>
    %c0_1 = arith.constant 0 : index
    %c0_2 = arith.constant 0 : index
    %2 = vector.load %arg1[%c0_1, %c0_2] : memref<32x128xbf16, #tpu.memory_space<vmem>>, vector<32x128xbf16>
    %cst = arith.constant dense<0.000000e+00> : vector<8x128xf32>
    %3 = tpu.matmul %1, %2, %cst {dimension_numbers = #tpu.dot_dimension_numbers<[1], [0], [0], [1], [0, 0, 1, 1], [], []>} : vector<8x32xbf16>, vector<32x128xbf16>, vector<8x128xf32> -> vector<8x128xf32>
    %c0_3 = arith.constant 0 : index
    %c0_4 = arith.constant 0 : index
    %4 = vector.load %arg3[%c0_3, %c0_4] : memref<1x128xf32, #tpu.memory_space<vmem>>, vector<1x128xf32>
    %5 = vector.broadcast %4 : vector<1x128xf32> to vector<8x128xf32>
    %6 = arith.addf %3, %5 : vector<8x128xf32>
    %cst_5 = arith.constant 0.000000e+00 : f32
    %7 = vector.broadcast %cst_5 : f32 to vector<8x128xf32>
    %8 = arith.maximumf %6, %7 : vector<8x128xf32>
    %9 = arith.truncf %8 : vector<8x128xf32> to vector<8x128xbf16>
    %c0_6 = arith.constant 0 : index
    %c0_7 = arith.constant 0 : index
    %10 = vector.load %arg2[%c0_6, %c0_7] : memref<128x16xbf16, #tpu.memory_space<vmem>>, vector<128x16xbf16>
    %cst_8 = arith.constant dense<0.000000e+00> : vector<8x16xf32>
    %11 = tpu.matmul %9, %10, %cst_8 {dimension_numbers = #tpu.dot_dimension_numbers<[1], [0], [0], [1], [0, 0, 1, 1], [], []>} : vector<8x128xbf16>, vector<128x16xbf16>, vector<8x16xf32> -> vector<8x16xf32>
    %c0_9 = arith.constant 0 : index
    %c0_10 = arith.constant 0 : index
    %12 = vector.load %arg4[%c0_9, %c0_10] : memref<1x16xf32, #tpu.memory_space<vmem>>, vector<1x16xf32>
    %13 = vector.broadcast %12 : vector<1x16xf32> to vector<8x16xf32>
    %14 = arith.addf %11, %13 : vector<8x16xf32>
    %c0_11 = arith.constant 0 : index
    %c0_12 = arith.constant 0 : index
    %15 = vector.load %arg5[%c0_11, %c0_12] : memref<8x16xf32, #tpu.memory_space<vmem>>, vector<8x16xf32>
    tpu.vector_store %arg5[%c0_11, %c0_12], %14 {strides = array<i32>} : memref<8x16xf32, #tpu.memory_space<vmem>>, vector<8x16xf32>,
    return
  }
}

</mosaic_0001>

<bundles_post_ra>
// kernel: sequential_forward.1
= control target key start
LH: loop header
LB: loop body
LE: loop exit
PB: predicated region body
PF: predicated region fallthrough
CT: control target
= control target key end

     0   :  { %v310_v1 = vmov 0.0   ;;  %vm311_vm0 = vmmov 0   ;;  %vm47_vm1 = vcmask 261120   ;;  %s394_s0 = inlined_call_operand.vmem [shape: f32[8,32], index: 0, kind: input, shape index: {}]   ;;  %s395_s1 = inlined_call_operand.vmem [shape: bf16[32,128], index: 1, kind: input, shape index: {}]   ;;  %s396_s2 = inlined_call_operand.vmem [shape: bf16[128,16], index: 2, kind: input, shape index: {}]   ;;  %s397_s3 = inlined_call_operand.vmem [shape: f32[1,128], index: 3, kind: input, shape index: {}]   ;;  %s398_s4 = inlined_call_operand.vmem [shape: f32[1,16], index: 4, kind: input, shape index: {}]   ;;  %s399_s5 = inlined_call_operand.hbm [shape: f32[8,16], index: 5, kind: output, shape index: {}]  }
   0x1   :  { %v276_v0 = vld [vmem:[%s395_s1] sm:$0xff]   ;;  %245 = vmatprep.subr.bf16.mxu0 %v310_v1  ;;  %v277_v2 = vld [vmem:[%s395_s1 + $0x8] sm:$0xff]   ;;  %253 = vmatprep.subr.bf16.mxu1 %v310_v1  ;;  %v280_v7 = vld [vmem:[%s396_s2 + $0x10] sm:$0xff]  }
   0x2   :  { %246 = vmatpush3.bf16.msra.mxu0 %v276_v0  ;;  %249 = vmatprep.mubr.msk.bf16.mxu0 %vm311_vm0, %v310_v1  ;;  %v22_v3 = vld [vmem:[%s394_s0] sm:$0xff]  ;;  %v279_v6 = vld [vmem:[%s396_s2 + $0x8] sm:$0xff]  }
   0x3   :  { %247 = vmatprep.subr.bf16.mxu0 %v310_v1  ;;  %v278_v4 = vld [vmem:[%s396_s2] sm:$0xff]   ;;  %269 = vmatprep.mubr.msk.bf16.mxu1 %vm311_vm0, %v310_v1  ;;  %v23_v5 = vpack.c.bf16 %v22_v3, %v22_v3 }
   0x4   :  { %254 = vmatpush3.bf16.msra.mxu1 %v278_v4 }
   0x5   :  { %255 = vmatprep.subr.bf16.mxu1 %v310_v1 }
   0x6   :  { %248 = vmatpush3.bf16.msra.mxu0 %v277_v2 }
   0x8   :  { %256 = vmatpush3.bf16.msra.mxu1 %v279_v6 }
   0x9   :  { %250 = vmatmul.mubr.msk.bf16.vlgmr.msra.gmra.mrb[0].mxu0 %vm47_vm1, %v23_v5  ;;  %257 = vmatprep.subr.bf16.mxu1 %v310_v1 }
   0xa   :  { %10 = vsyncpa [#allocation3], 0  ;;  %v281_v8 = vld [vmem:[%s396_s2 + $0x18] sm:$0xff]   ;;  %v282_v9 = vld [vmem:[%s396_s2 + $0x20] sm:$0xff]   ;;  %s312_s17 = smov [#allocation2]   ;;  %vm204_vm2 = vcmask 130048  }
   0xb   :  { %v283_v10 = vld [vmem:[%s396_s2 + $0x28] sm:$0xff]   ;;  %v284_v11 = vld [vmem:[%s396_s2 + $0x30] sm:$0xff]   ;;  %v285_v12 = vld [vmem:[%s396_s2 + $0x38] sm:$0xff]   ;;  %s212_s18 = sshll.u32 %s312_s17, 4  ;;  %s213_s18 = int_to_ptr.vmem [resolvable:$true] %s212_s18 }
   0xc   :  { %258 = vmatpush3.bf16.msra.mxu1 %v280_v7  ;;  %v220_v13 = vld [vmem:[%s397_s3] ss:$0 sm:$0xff]  ;;  %s286_s2 = scalar_lea.vmem %s213_s18, 128  ;;  %p291_p1 = scmp.lt.s32.totalorder %s213_s18, %s213_s18 }
   0xd   :  { %259 = vmatprep.subr.bf16.mxu1 %v310_v1  ;;  %v224_v21 = vld [vmem:[%s398_s4] ss:$0 sm:$0xff]  ;;  %p287_p0 = scmp.ne.s32.totalorder %s213_s18, %s286_s2  ;;  %p292_p2 = scmp.lt.s32.totalorder %s286_s2, %s286_s2 }
   0xf   :  { %p293_p3 = por %p292_p2, %p291_p1 }
  0x10   :  { %260 = vmatpush3.bf16.msra.mxu1 %v281_v8 }
  0x11   :  { %261 = vmatprep.subr.bf16.mxu1 %v310_v1  ;;  %p294_p4 = pnand %p293_p3, %p287_p0 }
  0x14   :  { %262 = vmatpush3.bf16.msra.mxu1 %v282_v9 }
  0x15   :  { %263 = vmatprep.subr.bf16.mxu1 %v310_v1 }
  0x18   :  { %264 = vmatpush3.bf16.msra.mxu1 %v283_v10 }
  0x19   :  { %265 = vmatprep.subr.bf16.mxu1 %v310_v1 }
  0x1c   :  { %266 = vmatpush3.bf16.msra.mxu1 %v284_v11 }
  0x1d   :  { %267 = vmatprep.subr.bf16.mxu1 %v310_v1 }
  0x20   :  { %268 = vmatpush3.bf16.msra.mxu1 %v285_v12 }
  0xdc   :  { %v85_v14 = vpop.f32.mrb[0].mxu0 }
  0xdd   :  { %v86_v15 = vadd.f32 %v220_v13, %v85_v14  ;;  %v251_v16 = vpop.f32.mrb[1].mxu0 }
  0xde   :  { %v88_v17 = vpop.f32.mrb[2].mxu0 }
  0xdf   :  { %v91_v18 = vmax.f32 %v86_v15, 0.0  ;;  %v252_v19 = vpop.f32.mrb[3].mxu0 }
  0xe1   :  { %v92_v20 = vpack.c.bf16 %v91_v18, %v91_v18 }
  0xe3   :  { %270 = vmatmul.mubr.bf16.vlgmr.msra.gmra.mrb[0].mxu1 %v92_v20 }
 0x1b6   :  { %v198_v22 = vpop.f32.mrb[0].mxu1 }
 0x1b7   :  { %v199_v23 = vadd.f32 %v224_v21, %v198_v22  ;;  %v271_v24 = vpop.f32.mrb[1].mxu1 }
 0x1b8   :  { %v201_v25 = vpop.f32.mrb[2].mxu1 }
 0x1b9   :  { %v272_v26 = vpop.f32.mrb[3].mxu1  ;;  %205 = vst.msk [vmem:[#allocation2] sm:$0xff] %vm204_vm2, %v199_v23 }
 0x1ba   :  { %297 = shalt.err (!%p294_p4)
}
 0x1bb   :  { %s298_s4 = scalar_lea.hbm %s399_s5, 128 }
 0x1bc   :  { %p299_p5 = scmp.ne.s32.totalorder %s399_s5, %s298_s4  ;;  %p302_p6 = scmp.lt.u32.totalorder %s298_s4, %s399_s5 }
 0x1be   :  { %p304_p7 = pnand %p302_p6, %p299_p5 }
 0x1c0   :  { %307 = shalt.err (!%p304_p7)
}
 0x1c1   :  { %215 = dma.vmem_to_hbm [thread:$0]  %s213_s18, 128, %s399_s5, [#allocation3]  }
 0x1c2   :  { %308 = dma.done.wait [#allocation3], 128  }
 0x1c3   :  { %309 = vsyncadd [#allocation3], 4294967168 }
 0x1c4   :  { %219 = vsyncpa [#allocation3], 1 }

</bundles_post_ra>
